<compile_context>
chip_gen: v5e
topology: v5e:2x2
jax: 0.10.0
libtpu: 0.0.40
codegen_flags: <defaults>
</compile_context>

<pallas_src>
import jax
import jax.numpy as jnp
from jax.experimental import pallas as pl
from jax.experimental.pallas import tpu as pltpu


def _round_up(x: int, m: int) -> int:
    return (x + m - 1) // m * m


def _default_vmem_limit_bytes() -> int:
    """Budget VMEM against the actual chip, leaving headroom for compiler scratch."""
    try:
        cap = pltpu.get_tpu_info().vmem_capacity_bytes
    except Exception:
        cap = 64 * 1024 * 1024  # conservative (v7x-sized) fallback
    return int(max(32 * 1024 * 1024, min(cap - 16 * 1024 * 1024, 112 * 1024 * 1024)))


def _maybe_single_buffered_spec(shape, index_map, single_buffer):
    if single_buffer:
        try:
            return pl.BlockSpec(shape, index_map, pipeline_mode=pl.Buffered(1))
        except TypeError:  # older jax without pipeline_mode: fall back to default
            pass
    return pl.BlockSpec(shape, index_map)


def _make_kernel(num_heads: int, head_dim: int, embed_dim: int, eps: float,
                 ts: int, num_k_steps: int):
    def kernel(x_ref, w_ref, bv_ref, qg_ref, kg_ref, q_ref, k_ref, v_ref, acc_ref):
        # Cast the x tile in-kernel (VPU cast hides under the MXU; x read once from HBM).
        x = x_ref[0].astype(w_ref.dtype)                              # (ts, tk)
        partial = jnp.dot(x, w_ref[...], preferred_element_type=jnp.float32)  # (ts, 3E_or_chunk->3E)

        def _finalize():
            # Hoist gamma broadcasts out of the per-head loop (no broadcast CSE in JAX).
            qg_b = jnp.broadcast_to(qg_ref[...], (ts, head_dim))      # (ts, D) f32
            kg_b = jnp.broadcast_to(kg_ref[...], (ts, head_dim))
            bv = bv_ref[...]                                          # (1, E) f32
            for h in range(num_heads):                                # static unroll
                off = h * head_dim
                qh = acc_ref[:, pl.ds(off, head_dim)]                 # (ts, D) f32
                kh = acc_ref[:, pl.ds(embed_dim + off, head_dim)]
                vh = acc_ref[:, pl.ds(2 * embed_dim + off, head_dim)]
                q_ms = jnp.mean(qh * qh, axis=-1, keepdims=True)
                k_ms = jnp.mean(kh * kh, axis=-1, keepdims=True)
                q_ref[0, h, :, :] = (qh * jax.lax.rsqrt(q_ms + eps) * qg_b).astype(q_ref.dtype)
                k_ref[0, h, :, :] = (kh * jax.lax.rsqrt(k_ms + eps) * kg_b).astype(k_ref.dtype)
                v_ref[0, h, :, :] = (vh + bv[:, off:off + head_dim]).astype(v_ref.dtype)

        if num_k_steps == 1:
            # Weight-resident fast path: single MXU pass, no accumulation loop.
            acc_ref[...] = partial
            _finalize()
        else:
            kk = pl.program_id(2)

            @pl.when(kk == 0)
            def _():
                acc_ref[...] = jnp.zeros_like(acc_ref)

            acc_ref[...] += partial
            pl.when(kk == num_k_steps - 1)(_finalize)

    return kernel


def prepare_params(w_qk, w_v, b_v, q_gamma, k_gamma, *, matmul_dtype=jnp.bfloat16):
    """One-time parameter prep: fuse both projections into a single (E, 3E) weight.

    Do this at parameter-load time (not per forward) so XLA never re-runs the
    transpose + concat + cast over the 3E x E weight on the forward path.
    """
    E = w_v.shape[0]
    D = q_gamma.shape[0]
    w_fused = jnp.concatenate([w_qk.T, w_v.T], axis=1).astype(matmul_dtype)   # (E, 3E)
    return dict(
        w_fused=w_fused,
        b_v=b_v.reshape(1, E).astype(jnp.float32),
        q_gamma=q_gamma.reshape(1, D).astype(jnp.float32),
        k_gamma=k_gamma.reshape(1, D).astype(jnp.float32),
    )


def dismantled_pre_attention(x, params, *, num_heads: int, eps: float = 1e-6,
                             tile_s: int | None = None, out_dtype=None,
                             vmem_limit_bytes: int | None = None):
    """x: (B, S, E). Returns (q, k, v) each shaped (B, num_heads, S, head_dim)."""
    B, S, E = x.shape
    assert E % num_heads == 0
    D = E // num_heads
    w = params["w_fused"]
    assert w.shape == (E, 3 * E)

    out_dtype = x.dtype if out_dtype is None else out_dtype
    out_item = jnp.dtype(out_dtype).itemsize
    x_item = jnp.dtype(x.dtype).itemsize
    w_item = jnp.dtype(w.dtype).itemsize

    vmem_limit = _default_vmem_limit_bytes() if vmem_limit_bytes is None else int(vmem_limit_bytes)
    budget = int(0.85 * vmem_limit)

    # --- weight residency / K (reduction over E) tiling --------------------
    w_bytes = E * 3 * E * w_item
    if w_bytes <= budget // 2:
        tk = E                                   # fully resident, single-buffered
    else:
        tk = None
        for cand in (2048, 1024, 512, 256, 128):
            if E % cand == 0 and 2 * cand * 3 * E * w_item <= budget // 2:
                tk = cand
                break
        if tk is None:
            # TODO(synk): N-tile the 3E output columns (head-aligned chunks) for
            # extreme E; fall back to the resident path here.
            tk = E
    num_k_steps = E // tk
    single_buffer_w = (num_k_steps == 1)

    # --- sequence tile: scale with E, then shrink to fit the VMEM budget ----
    if tile_s is None:
        tile_s = 512 if E <= 1024 else 256
    ts = min(tile_s, _round_up(S, 8))

    def vmem_est(ts_):
        x_buf = 2 * ts_ * tk * x_item
        w_buf = (1 if single_buffer_w else 2) * tk * 3 * E * w_item
        out_buf = 2 * 3 * ts_ * E * out_item
        acc = ts_ * 3 * E * 4
        return x_buf + w_buf + out_buf + acc

    while ts > 8 and vmem_est(ts) > budget:
        ts = max(8, _round_up(ts // 2, 8))

    num_s_tiles = pl.cdiv(S, ts)                 # ragged tail handled by Pallas masking
    grid = (B, num_s_tiles, num_k_steps)

    const2 = lambda b, s, k: (0, 0)
    w_spec = _maybe_single_buffered_spec((tk, 3 * E), lambda b, s, k: (k, 0), single_buffer_w)
    in_specs = [
        pl.BlockSpec((1, ts, tk), lambda b, s, k: (b, s, k)),     # x row-slab (native dtype)
        w_spec,                                                   # fused W^T
        _maybe_single_buffered_spec((1, E), const2, True),        # b_v
        _maybe_single_buffered_spec((1, D), const2, True),        # q_norm gamma
        _maybe_single_buffered_spec((1, D), const2, True),        # k_norm gamma
    ]
    out_spec = pl.BlockSpec((1, num_heads, ts, D), lambda b, s, k: (b, 0, s, 0))
    out_shape = jax.ShapeDtypeStruct((B, num_heads, S, D), out_dtype)

    w_reads = 1 if single_buffer_w else B * num_s_tiles
    flops = 2 * B * S * E * 3 * E
    bytes_accessed = (B * S * E * x_item
                      + w_reads * 3 * E * E * w_item
                      + (E + 2 * D) * 4
                      + 3 * B * S * E * out_item)

    kernel = _make_kernel(num_heads, D, E, eps, ts, num_k_steps)

    q, k, v = pl.pallas_call(
        kernel,
        out_shape=(out_shape, out_shape, out_shape),
        grid_spec=pltpu.PrefetchScalarGridSpec(
            num_scalar_prefetch=0,
            grid=grid,
            in_specs=in_specs,
            out_specs=[out_spec, out_spec, out_spec],
            scratch_shapes=[pltpu.VMEM((ts, 3 * E), jnp.float32)]),
        compiler_params=pltpu.CompilerParams(
            dimension_semantics=("parallel", "parallel", "arbitrary"),
            vmem_limit_bytes=vmem_limit),
        cost_estimate=pl.CostEstimate(
            flops=flops,
            transcendentals=2 * B * S * num_heads,
            bytes_accessed=bytes_accessed),
    )(x, params["w_fused"], params["b_v"], params["q_gamma"], params["k_gamma"])

    return q, k, v


def _reference(x, w_qk, w_v, b_v, q_gamma, k_gamma, *, num_heads,
               eps=1e-6, matmul_dtype=jnp.float32):
    """Pure-JAX reference matching the PyTorch module; matmul_dtype controls the
    projection input precision (f32 accumulation either way)."""
    B, S, E = x.shape
    D = E // num_heads
    to_mha = lambda t: t.reshape(B, S, num_heads, D).transpose(0, 2, 1, 3)

    xm = x.astype(matmul_dtype)
    qk = jnp.dot(xm, w_qk.T.astype(matmul_dtype), preferred_element_type=jnp.float32)
    q, k = qk[..., :E], qk[..., E:]
    v = jnp.dot(xm, w_v.T.astype(matmul_dtype), preferred_element_type=jnp.float32) + b_v

    def rmsnorm(t, g):
        ms = jnp.mean(t * t, axis=-1, keepdims=True)
        return t * jax.lax.rsqrt(ms + eps) * g

    return rmsnorm(to_mha(q), q_gamma), rmsnorm(to_mha(k), k_gamma), to_mha(v)


if __name__ == "__main__":
    # Small shapes consistent with the module's forward.
    B, S, E, H = 2, 8, 32, 4
    D = E // H

    key = jax.random.PRNGKey(0)
    kx, kqk, kv, kb, kqg, kkg = jax.random.split(key, 6)

    x = jax.random.normal(kx, (B, S, E), dtype=jnp.float32)
    w_qk = jax.random.normal(kqk, (2 * E, E), dtype=jnp.float32) * 0.05   # Linear(E, 2E), no bias
    w_v = jax.random.normal(kv, (E, E), dtype=jnp.float32) * 0.05         # Linear(E, E)
    b_v = jax.random.normal(kb, (E,), dtype=jnp.float32) * 0.05
    q_gamma = 1.0 + 0.1 * jax.random.normal(kqg, (D,), dtype=jnp.float32)  # RMSNorm(D).weight
    k_gamma = 1.0 + 0.1 * jax.random.normal(kkg, (D,), dtype=jnp.float32)

    params = prepare_params(w_qk, w_v, b_v, q_gamma, k_gamma)              # one-time prep
    q, k, v = dismantled_pre_attention(x, params, num_heads=H)
    jax.block_until_ready((q, k, v))

    assert q.shape == (B, H, S, D) and k.shape == (B, H, S, D) and v.shape == (B, H, S, D)

    # Tight check against a reference using identical bf16 projection inputs
    # (same quantization, f32 accumulation).
    q_r, k_r, v_r = _reference(x, w_qk, w_v, b_v, q_gamma, k_gamma,
                               num_heads=H, matmul_dtype=jnp.bfloat16)
    assert jnp.allclose(q, q_r, atol=1e-4, rtol=1e-4)
    assert jnp.allclose(k, k_r, atol=1e-4, rtol=1e-4)
    assert jnp.allclose(v, v_r, atol=1e-4, rtol=1e-4)

    # Loose sanity check against the full-f32 PyTorch-equivalent reference.
    q_f, k_f, v_f = _reference(x, w_qk, w_v, b_v, q_gamma, k_gamma,
                               num_heads=H, matmul_dtype=jnp.float32)
    assert jnp.allclose(q, q_f, atol=3e-2, rtol=3e-2)
    assert jnp.allclose(k, k_f, atol=3e-2, rtol=3e-2)
    assert jnp.allclose(v, v_f, atol=3e-2, rtol=3e-2)

    print("KERNEL_OK")
</pallas_src>

<mosaic_0001>
module attributes {stable_mosaic.version = 11 : i64} {
  func.func @kernel(%arg0: i32, %arg1: i32, %arg2: i32, %arg3: memref<1x8x32xf32, #tpu.memory_space<vmem>>, %arg4: memref<32x96xbf16, #tpu.memory_space<vmem>>, %arg5: memref<1x32xf32, #tpu.memory_space<vmem>>, %arg6: memref<1x8xf32, #tpu.memory_space<vmem>>, %arg7: memref<1x8xf32, #tpu.memory_space<vmem>>, %arg8: memref<1x4x8x8xf32, #tpu.memory_space<vmem>>, %arg9: memref<1x4x8x8xf32, #tpu.memory_space<vmem>>, %arg10: memref<1x4x8x8xf32, #tpu.memory_space<vmem>>, %arg11: memref<8x96xf32, #tpu.memory_space<vmem>>) attributes {dimension_semantics = [#tpu.dimension_semantics<parallel>, #tpu.dimension_semantics<parallel>, #tpu.dimension_semantics<arbitrary>], iteration_bounds = array<i64: 2, 1, 1>, scalar_prefetch = 0 : i64, scratch_operands = 1 : i64, tpu.core_type = #tpu.core_type<tc>, window_params = [{transform_indices = @transform_0, window_bounds = array<i64: 1, 8, 32>}, {pipeline_mode = #tpu.pipeline_mode<synchronous>, transform_indices = @transform_1, window_bounds = array<i64: 32, 96>}, {pipeline_mode = #tpu.pipeline_mode<synchronous>, transform_indices = @transform_2, window_bounds = array<i64: 1, 32>}, {pipeline_mode = #tpu.pipeline_mode<synchronous>, transform_indices = @transform_3, window_bounds = array<i64: 1, 8>}, {pipeline_mode = #tpu.pipeline_mode<synchronous>, transform_indices = @transform_4, window_bounds = array<i64: 1, 8>}, {transform_indices = @transform_5, window_bounds = array<i64: 1, 4, 8, 8>}, {transform_indices = @transform_6, window_bounds = array<i64: 1, 4, 8, 8>}, {transform_indices = @transform_7, window_bounds = array<i64: 1, 4, 8, 8>}]} {
    %c0 = arith.constant 0 : index
    %c0_0 = arith.constant 0 : index
    %c0_1 = arith.constant 0 : index
    %0 = vector.load %arg3[%c0, %c0_0, %c0_1] : memref<1x8x32xf32, #tpu.memory_space<vmem>>, vector<1x8x32xf32>
    %1 = vector.shape_cast %0 : vector<1x8x32xf32> to vector<8x32xf32>
    %2 = arith.truncf %1 : vector<8x32xf32> to vector<8x32xbf16>
    %c0_2 = arith.constant 0 : index
    %c0_3 = arith.constant 0 : index
    %3 = vector.load %arg4[%c0_2, %c0_3] : memref<32x96xbf16, #tpu.memory_space<vmem>>, vector<32x96xbf16>
    %cst = arith.constant dense<0.000000e+00> : vector<8x96xf32>
    %4 = tpu.matmul %2, %3, %cst {dimension_numbers = #tpu.dot_dimension_numbers<[1], [0], [0], [1], [0, 0, 1, 1], [], []>} : vector<8x32xbf16>, vector<32x96xbf16>, vector<8x96xf32> -> vector<8x96xf32>
    %c0_4 = arith.constant 0 : index
    %c0_5 = arith.constant 0 : index
    %5 = vector.load %arg11[%c0_4, %c0_5] : memref<8x96xf32, #tpu.memory_space<vmem>>, vector<8x96xf32>
    tpu.vector_store %arg11[%c0_4, %c0_5], %4 {strides = array<i32>} : memref<8x96xf32, #tpu.memory_space<vmem>>, vector<8x96xf32>,
    %c0_6 = arith.constant 0 : index
    %c0_7 = arith.constant 0 : index
    %6 = vector.load %arg6[%c0_6, %c0_7] : memref<1x8xf32, #tpu.memory_space<vmem>>, vector<1x8xf32>
    %7 = vector.shape_cast %6 : vector<1x8xf32> to vector<1x8xf32>
    %8 = vector.broadcast %7 : vector<1x8xf32> to vector<8x8xf32>
    %c0_8 = arith.constant 0 : index
    %c0_9 = arith.constant 0 : index
    %9 = vector.load %arg7[%c0_8, %c0_9] : memref<1x8xf32, #tpu.memory_space<vmem>>, vector<1x8xf32>
    %10 = vector.shape_cast %9 : vector<1x8xf32> to vector<1x8xf32>
    %11 = vector.broadcast %10 : vector<1x8xf32> to vector<8x8xf32>
    %c0_10 = arith.constant 0 : index
    %c0_11 = arith.constant 0 : index
    %12 = vector.load %arg5[%c0_10, %c0_11] : memref<1x32xf32, #tpu.memory_space<vmem>>, vector<1x32xf32>
    %c0_12 = arith.constant 0 : index
    %c0_13 = arith.constant 0 : index
    %13 = vector.load %arg11[%c0_12, %c0_13] : memref<8x96xf32, #tpu.memory_space<vmem>>, vector<8x8xf32>
    %c0_14 = arith.constant 0 : index
    %c32 = arith.constant 32 : index
    %14 = vector.load %arg11[%c0_14, %c32] : memref<8x96xf32, #tpu.memory_space<vmem>>, vector<8x8xf32>
    %c0_15 = arith.constant 0 : index
    %c64 = arith.constant 64 : index
    %15 = vector.load %arg11[%c0_15, %c64] : memref<8x96xf32, #tpu.memory_space<vmem>>, vector<8x8xf32>
    %16 = arith.mulf %13, %13 : vector<8x8xf32>
    %cst_16 = arith.constant dense<0.000000e+00> : vector<8xf32>
    %17 = vector.multi_reduction <add>, %16, %cst_16 [1] : vector<8x8xf32> to vector<8xf32>
    %18 = vector.shape_cast %17 : vector<8xf32> to vector<8x1xf32>
    %cst_17 = arith.constant 8.000000e+00 : f32
    %19 = vector.broadcast %cst_17 : f32 to vector<8x1xf32>
    %20 = arith.divf %18, %19 : vector<8x1xf32>
    %21 = arith.mulf %14, %14 : vector<8x8xf32>
    %cst_18 = arith.constant dense<0.000000e+00> : vector<8xf32>
    %22 = vector.multi_reduction <add>, %21, %cst_18 [1] : vector<8x8xf32> to vector<8xf32>
    %23 = vector.shape_cast %22 : vector<8xf32> to vector<8x1xf32>
    %cst_19 = arith.constant 8.000000e+00 : f32
    %24 = vector.broadcast %cst_19 : f32 to vector<8x1xf32>
    %25 = arith.divf %23, %24 : vector<8x1xf32>
    %cst_20 = arith.constant 9.99999997E-7 : f32
    %26 = vector.broadcast %cst_20 : f32 to vector<8x1xf32>
    %27 = arith.addf %20, %26 : vector<8x1xf32>
    %28 = math.rsqrt %27 : vector<8x1xf32>
    %29 = vector.broadcast %28 : vector<8x1xf32> to vector<8x8xf32>
    %30 = arith.mulf %13, %29 : vector<8x8xf32>
    %31 = arith.mulf %30, %8 : vector<8x8xf32>
    %c0_21 = arith.constant 0 : index
    %c0_22 = arith.constant 0 : index
    %c0_23 = arith.constant 0 : index
    %c0_24 = arith.constant 0 : index
    %32 = vector.load %arg8[%c0_21, %c0_22, %c0_23, %c0_24] : memref<1x4x8x8xf32, #tpu.memory_space<vmem>>, vector<1x1x8x8xf32>
    %33 = vector.shape_cast %32 : vector<1x1x8x8xf32> to vector<8x8xf32>
    %34 = vector.shape_cast %31 : vector<8x8xf32> to vector<1x1x8x8xf32>
    tpu.vector_store %arg8[%c0_21, %c0_22, %c0_23, %c0_24], %34 {strides = array<i32>} : memref<1x4x8x8xf32, #tpu.memory_space<vmem>>, vector<1x1x8x8xf32>,
    %cst_25 = arith.constant 9.99999997E-7 : f32
    %35 = vector.broadcast %cst_25 : f32 to vector<8x1xf32>
    %36 = arith.addf %25, %35 : vector<8x1xf32>
    %37 = math.rsqrt %36 : vector<8x1xf32>
    %38 = vector.broadcast %37 : vector<8x1xf32> to vector<8x8xf32>
    %39 = arith.mulf %14, %38 : vector<8x8xf32>
    %40 = arith.mulf %39, %11 : vector<8x8xf32>
    %c0_26 = arith.constant 0 : index
    %c0_27 = arith.constant 0 : index
    %c0_28 = arith.constant 0 : index
    %c0_29 = arith.constant 0 : index
    %41 = vector.load %arg9[%c0_26, %c0_27, %c0_28, %c0_29] : memref<1x4x8x8xf32, #tpu.memory_space<vmem>>, vector<1x1x8x8xf32>
    %42 = vector.shape_cast %41 : vector<1x1x8x8xf32> to vector<8x8xf32>
    %43 = vector.shape_cast %40 : vector<8x8xf32> to vector<1x1x8x8xf32>
    tpu.vector_store %arg9[%c0_26, %c0_27, %c0_28, %c0_29], %43 {strides = array<i32>} : memref<1x4x8x8xf32, #tpu.memory_space<vmem>>, vector<1x1x8x8xf32>,
    %44 = vector.extract_strided_slice %12 {offsets = [0, 0], sizes = [1, 8], strides = [1, 1]} : vector<1x32xf32> to vector<1x8xf32>
    %45 = vector.broadcast %44 : vector<1x8xf32> to vector<8x8xf32>
    %46 = arith.addf %15, %45 : vector<8x8xf32>
    %c0_30 = arith.constant 0 : index
    %c0_31 = arith.constant 0 : index
    %c0_32 = arith.constant 0 : index
    %c0_33 = arith.constant 0 : index
    %47 = vector.load %arg10[%c0_30, %c0_31, %c0_32, %c0_33] : memref<1x4x8x8xf32, #tpu.memory_space<vmem>>, vector<1x1x8x8xf32>
    %48 = vector.shape_cast %47 : vector<1x1x8x8xf32> to vector<8x8xf32>
    %49 = vector.shape_cast %46 : vector<8x8xf32> to vector<1x1x8x8xf32>
    tpu.vector_store %arg10[%c0_30, %c0_31, %c0_32, %c0_33], %49 {strides = array<i32>} : memref<1x4x8x8xf32, #tpu.memory_space<vmem>>, vector<1x1x8x8xf32>,
    %c0_34 = arith.constant 0 : index
    %c8 = arith.constant 8 : index
    %50 = vector.load %arg11[%c0_34, %c8] : memref<8x96xf32, #tpu.memory_space<vmem>>, vector<8x8xf32>
    %c0_35 = arith.constant 0 : index
    %c40 = arith.constant 40 : index
    %51 = vector.load %arg11[%c0_35, %c40] : memref<8x96xf32, #tpu.memory_space<vmem>>, vector<8x8xf32>
    %c0_36 = arith.constant 0 : index
    %c72 = arith.constant 72 : index
    %52 = vector.load %arg11[%c0_36, %c72] : memref<8x96xf32, #tpu.memory_space<vmem>>, vector<8x8xf32>
    %53 = arith.mulf %50, %50 : vector<8x8xf32>
    %cst_37 = arith.constant dense<0.000000e+00> : vector<8xf32>
    %54 = vector.multi_reduction <add>, %53, %cst_37 [1] : vector<8x8xf32> to vector<8xf32>
    %55 = vector.shape_cast %54 : vector<8xf32> to vector<8x1xf32>
    %cst_38 = arith.constant 8.000000e+00 : f32
    %56 = vector.broadcast %cst_38 : f32 to vector<8x1xf32>
    %57 = arith.divf %55, %56 : vector<8x1xf32>
    %58 = arith.mulf %51, %51 : vector<8x8xf32>
    %cst_39 = arith.constant dense<0.000000e+00> : vector<8xf32>
    %59 = vector.multi_reduction <add>, %58, %cst_39 [1] : vector<8x8xf32> to vector<8xf32>
    %60 = vector.shape_cast %59 : vector<8xf32> to vector<8x1xf32>
    %cst_40 = arith.constant 8.000000e+00 : f32
    %61 = vector.broadcast %cst_40 : f32 to vector<8x1xf32>
    %62 = arith.divf %60, %61 : vector<8x1xf32>
    %cst_41 = arith.constant 9.99999997E-7 : f32
    %63 = vector.broadcast %cst_41 : f32 to vector<8x1xf32>
    %64 = arith.addf %57, %63 : vector<8x1xf32>
    %65 = math.rsqrt %64 : vector<8x1xf32>
    %66 = vector.broadcast %65 : vector<8x1xf32> to vector<8x8xf32>
    %67 = arith.mulf %50, %66 : vector<8x8xf32>
    %68 = arith.mulf %67, %8 : vector<8x8xf32>
    %c0_42 = arith.constant 0 : index
    %c1 = arith.constant 1 : index
    %c0_43 = arith.constant 0 : index
    %c0_44 = arith.constant 0 : index
    %69 = vector.load %arg8[%c0_42, %c1, %c0_43, %c0_44] : memref<1x4x8x8xf32, #tpu.memory_space<vmem>>, vector<1x1x8x8xf32>
    %70 = vector.shape_cast %69 : vector<1x1x8x8xf32> to vector<8x8xf32>
    %71 = vector.shape_cast %68 : vector<8x8xf32> to vector<1x1x8x8xf32>
    tpu.vector_store %arg8[%c0_42, %c1, %c0_43, %c0_44], %71 {strides = array<i32>} : memref<1x4x8x8xf32, #tpu.memory_space<vmem>>, vector<1x1x8x8xf32>,
    %cst_45 = arith.constant 9.99999997E-7 : f32
    %72 = vector.broadcast %cst_45 : f32 to vector<8x1xf32>
    %73 = arith.addf %62, %72 : vector<8x1xf32>
    %74 = math.rsqrt %73 : vector<8x1xf32>
    %75 = vector.broadcast %74 : vector<8x1xf32> to vector<8x8xf32>
    %76 = arith.mulf %51, %75 : vector<8x8xf32>
    %77 = arith.mulf %76, %11 : vector<8x8xf32>
    %c0_46 = arith.constant 0 : index
    %c1_47 = arith.constant 1 : index
    %c0_48 = arith.constant 0 : index
    %c0_49 = arith.constant 0 : index
    %78 = vector.load %arg9[%c0_46, %c1_47, %c0_48, %c0_49] : memref<1x4x8x8xf32, #tpu.memory_space<vmem>>, vector<1x1x8x8xf32>
    %79 = vector.shape_cast %78 : vector<1x1x8x8xf32> to vector<8x8xf32>
    %80 = vector.shape_cast %77 : vector<8x8xf32> to vector<1x1x8x8xf32>
    tpu.vector_store %arg9[%c0_46, %c1_47, %c0_48, %c0_49], %80 {strides = array<i32>} : memref<1x4x8x8xf32, #tpu.memory_space<vmem>>, vector<1x1x8x8xf32>,
    %81 = vector.extract_strided_slice %12 {offsets = [0, 8], sizes = [1, 8], strides = [1, 1]} : vector<1x32xf32> to vector<1x8xf32>
    %82 = vector.broadcast %81 : vector<1x8xf32> to vector<8x8xf32>
    %83 = arith.addf %52, %82 : vector<8x8xf32>
    %c0_50 = arith.constant 0 : index
    %c1_51 = arith.constant 1 : index
    %c0_52 = arith.constant 0 : index
    %c0_53 = arith.constant 0 : index
    %84 = vector.load %arg10[%c0_50, %c1_51, %c0_52, %c0_53] : memref<1x4x8x8xf32, #tpu.memory_space<vmem>>, vector<1x1x8x8xf32>
    %85 = vector.shape_cast %84 : vector<1x1x8x8xf32> to vector<8x8xf32>
    %86 = vector.shape_cast %83 : vector<8x8xf32> to vector<1x1x8x8xf32>
    tpu.vector_store %arg10[%c0_50, %c1_51, %c0_52, %c0_53], %86 {strides = array<i32>} : memref<1x4x8x8xf32, #tpu.memory_space<vmem>>, vector<1x1x8x8xf32>,
    %c0_54 = arith.constant 0 : index
    %c16 = arith.constant 16 : index
    %87 = vector.load %arg11[%c0_54, %c16] : memref<8x96xf32, #tpu.memory_space<vmem>>, vector<8x8xf32>
    %c0_55 = arith.constant 0 : index
    %c48 = arith.constant 48 : index
    %88 = vector.load %arg11[%c0_55, %c48] : memref<8x96xf32, #tpu.memory_space<vmem>>, vector<8x8xf32>
    %c0_56 = arith.constant 0 : index
    %c80 = arith.constant 80 : index
    %89 = vector.load %arg11[%c0_56, %c80] : memref<8x96xf32, #tpu.memory_space<vmem>>, vector<8x8xf32>
    %90 = arith.mulf %87, %87 : vector<8x8xf32>
    %cst_57 = arith.constant dense<0.000000e+00> : vector<8xf32>
    %91 = vector.multi_reduction <add>, %90, %cst_57 [1] : vector<8x8xf32> to vector<8xf32>
    %92 = vector.shape_cast %91 : vector<8xf32> to vector<8x1xf32>
    %cst_58 = arith.constant 8.000000e+00 : f32
    %93 = vector.broadcast %cst_58 : f32 to vector<8x1xf32>
    %94 = arith.divf %92, %93 : vector<8x1xf32>
    %95 = arith.mulf %88, %88 : vector<8x8xf32>
    %cst_59 = arith.constant dense<0.000000e+00> : vector<8xf32>
    %96 = vector.multi_reduction <add>, %95, %cst_59 [1] : vector<8x8xf32> to vector<8xf32>
    %97 = vector.shape_cast %96 : vector<8xf32> to vector<8x1xf32>
    %cst_60 = arith.constant 8.000000e+00 : f32
    %98 = vector.broadcast %cst_60 : f32 to vector<8x1xf32>
    %99 = arith.divf %97, %98 : vector<8x1xf32>
    %cst_61 = arith.constant 9.99999997E-7 : f32
    %100 = vector.broadcast %cst_61 : f32 to vector<8x1xf32>
    %101 = arith.addf %94, %100 : vector<8x1xf32>
    %102 = math.rsqrt %101 : vector<8x1xf32>
    %103 = vector.broadcast %102 : vector<8x1xf32> to vector<8x8xf32>
    %104 = arith.mulf %87, %103 : vector<8x8xf32>
    %105 = arith.mulf %104, %8 : vector<8x8xf32>
    %c0_62 = arith.constant 0 : index
    %c2 = arith.constant 2 : index
    %c0_63 = arith.constant 0 : index
    %c0_64 = arith.constant 0 : index
    %106 = vector.load %arg8[%c0_62, %c2, %c0_63, %c0_64] : memref<1x4x8x8xf32, #tpu.memory_space<vmem>>, vector<1x1x8x8xf32>
    %107 = vector.shape_cast %106 : vector<1x1x8x8xf32> to vector<8x8xf32>
    %108 = vector.shape_cast %105 : vector<8x8xf32> to vector<1x1x8x8xf32>
    tpu.vector_store %arg8[%c0_62, %c2, %c0_63, %c0_64], %108 {strides = array<i32>} : memref<1x4x8x8xf32, #tpu.memory_space<vmem>>, vector<1x1x8x8xf32>,
    %cst_65 = arith.constant 9.99999997E-7 : f32
    %109 = vector.broadcast %cst_65 : f32 to vector<8x1xf32>
    %110 = arith.addf %99, %109 : vector<8x1xf32>
    %111 = math.rsqrt %110 : vector<8x1xf32>
    %112 = vector.broadcast %111 : vector<8x1xf32> to vector<8x8xf32>
    %113 = arith.mulf %88, %112 : vector<8x8xf32>
    %114 = arith.mulf %113, %11 : vector<8x8xf32>
    %c0_66 = arith.constant 0 : index
    %c2_67 = arith.constant 2 : index
    %c0_68 = arith.constant 0 : index
    %c0_69 = arith.constant 0 : index
    %115 = vector.load %arg9[%c0_66, %c2_67, %c0_68, %c0_69] : memref<1x4x8x8xf32, #tpu.memory_space<vmem>>, vector<1x1x8x8xf32>
    %116 = vector.shape_cast %115 : vector<1x1x8x8xf32> to vector<8x8xf32>
    %117 = vector.shape_cast %114 : vector<8x8xf32> to vector<1x1x8x8xf32>
    tpu.vector_store %arg9[%c0_66, %c2_67, %c0_68, %c0_69], %117 {strides = array<i32>} : memref<1x4x8x8xf32, #tpu.memory_space<vmem>>, vector<1x1x8x8xf32>,
    %118 = vector.extract_strided_slice %12 {offsets = [0, 16], sizes = [1, 8], strides = [1, 1]} : vector<1x32xf32> to vector<1x8xf32>
    %119 = vector.broadcast %118 : vector<1x8xf32> to vector<8x8xf32>
    %120 = arith.addf %89, %119 : vector<8x8xf32>
    %c0_70 = arith.constant 0 : index
    %c2_71 = arith.constant 2 : index
    %c0_72 = arith.constant 0 : index
    %c0_73 = arith.constant 0 : index
    %121 = vector.load %arg10[%c0_70, %c2_71, %c0_72, %c0_73] : memref<1x4x8x8xf32, #tpu.memory_space<vmem>>, vector<1x1x8x8xf32>
    %122 = vector.shape_cast %121 : vector<1x1x8x8xf32> to vector<8x8xf32>
    %123 = vector.shape_cast %120 : vector<8x8xf32> to vector<1x1x8x8xf32>
    tpu.vector_store %arg10[%c0_70, %c2_71, %c0_72, %c0_73], %123 {strides = array<i32>} : memref<1x4x8x8xf32, #tpu.memory_space<vmem>>, vector<1x1x8x8xf32>,
    %c0_74 = arith.constant 0 : index
    %c24 = arith.constant 24 : index
    %124 = vector.load %arg11[%c0_74, %c24] : memref<8x96xf32, #tpu.memory_space<vmem>>, vector<8x8xf32>
    %c0_75 = arith.constant 0 : index
    %c56 = arith.constant 56 : index
    %125 = vector.load %arg11[%c0_75, %c56] : memref<8x96xf32, #tpu.memory_space<vmem>>, vector<8x8xf32>
    %c0_76 = arith.constant 0 : index
    %c88 = arith.constant 88 : index
    %126 = vector.load %arg11[%c0_76, %c88] : memref<8x96xf32, #tpu.memory_space<vmem>>, vector<8x8xf32>
    %127 = arith.mulf %124, %124 : vector<8x8xf32>
    %cst_77 = arith.constant dense<0.000000e+00> : vector<8xf32>
    %128 = vector.multi_reduction <add>, %127, %cst_77 [1] : vector<8x8xf32> to vector<8xf32>
    %129 = vector.shape_cast %128 : vector<8xf32> to vector<8x1xf32>
    %cst_78 = arith.constant 8.000000e+00 : f32
    %130 = vector.broadcast %cst_78 : f32 to vector<8x1xf32>
    %131 = arith.divf %129, %130 : vector<8x1xf32>
    %132 = arith.mulf %125, %125 : vector<8x8xf32>
    %cst_79 = arith.constant dense<0.000000e+00> : vector<8xf32>
    %133 = vector.multi_reduction <add>, %132, %cst_79 [1] : vector<8x8xf32> to vector<8xf32>
    %134 = vector.shape_cast %133 : vector<8xf32> to vector<8x1xf32>
    %cst_80 = arith.constant 8.000000e+00 : f32
    %135 = vector.broadcast %cst_80 : f32 to vector<8x1xf32>
    %136 = arith.divf %134, %135 : vector<8x1xf32>
    %cst_81 = arith.constant 9.99999997E-7 : f32
    %137 = vector.broadcast %cst_81 : f32 to vector<8x1xf32>
    %138 = arith.addf %131, %137 : vector<8x1xf32>
    %139 = math.rsqrt %138 : vector<8x1xf32>
    %140 = vector.broadcast %139 : vector<8x1xf32> to vector<8x8xf32>
    %141 = arith.mulf %124, %140 : vector<8x8xf32>
    %142 = arith.mulf %141, %8 : vector<8x8xf32>
    %c0_82 = arith.constant 0 : index
    %c3 = arith.constant 3 : index
    %c0_83 = arith.constant 0 : index
    %c0_84 = arith.constant 0 : index
    %143 = vector.load %arg8[%c0_82, %c3, %c0_83, %c0_84] : memref<1x4x8x8xf32, #tpu.memory_space<vmem>>, vector<1x1x8x8xf32>
    %144 = vector.shape_cast %143 : vector<1x1x8x8xf32> to vector<8x8xf32>
    %145 = vector.shape_cast %142 : vector<8x8xf32> to vector<1x1x8x8xf32>
    tpu.vector_store %arg8[%c0_82, %c3, %c0_83, %c0_84], %145 {strides = array<i32>} : memref<1x4x8x8xf32, #tpu.memory_space<vmem>>, vector<1x1x8x8xf32>,
    %cst_85 = arith.constant 9.99999997E-7 : f32
    %146 = vector.broadcast %cst_85 : f32 to vector<8x1xf32>
    %147 = arith.addf %136, %146 : vector<8x1xf32>
    %148 = math.rsqrt %147 : vector<8x1xf32>
    %149 = vector.broadcast %148 : vector<8x1xf32> to vector<8x8xf32>
    %150 = arith.mulf %125, %149 : vector<8x8xf32>
    %151 = arith.mulf %150, %11 : vector<8x8xf32>
    %c0_86 = arith.constant 0 : index
    %c3_87 = arith.constant 3 : index
    %c0_88 = arith.constant 0 : index
    %c0_89 = arith.constant 0 : index
    %152 = vector.load %arg9[%c0_86, %c3_87, %c0_88, %c0_89] : memref<1x4x8x8xf32, #tpu.memory_space<vmem>>, vector<1x1x8x8xf32>
    %153 = vector.shape_cast %152 : vector<1x1x8x8xf32> to vector<8x8xf32>
    %154 = vector.shape_cast %151 : vector<8x8xf32> to vector<1x1x8x8xf32>
    tpu.vector_store %arg9[%c0_86, %c3_87, %c0_88, %c0_89], %154 {strides = array<i32>} : memref<1x4x8x8xf32, #tpu.memory_space<vmem>>, vector<1x1x8x8xf32>,
    %155 = vector.extract_strided_slice %12 {offsets = [0, 24], sizes = [1, 8], strides = [1, 1]} : vector<1x32xf32> to vector<1x8xf32>
    %156 = vector.broadcast %155 : vector<1x8xf32> to vector<8x8xf32>
    %157 = arith.addf %126, %156 : vector<8x8xf32>
    %c0_90 = arith.constant 0 : index
    %c3_91 = arith.constant 3 : index
    %c0_92 = arith.constant 0 : index
    %c0_93 = arith.constant 0 : index
    %158 = vector.load %arg10[%c0_90, %c3_91, %c0_92, %c0_93] : memref<1x4x8x8xf32, #tpu.memory_space<vmem>>, vector<1x1x8x8xf32>
    %159 = vector.shape_cast %158 : vector<1x1x8x8xf32> to vector<8x8xf32>
    %160 = vector.shape_cast %157 : vector<8x8xf32> to vector<1x1x8x8xf32>
    tpu.vector_store %arg10[%c0_90, %c3_91, %c0_92, %c0_93], %160 {strides = array<i32>} : memref<1x4x8x8xf32, #tpu.memory_space<vmem>>, vector<1x1x8x8xf32>,
    return
  }
  func.func @transform_0(%arg0: i32, %arg1: i32, %arg2: i32) -> (i32, i32, i32) {
    %c0_i32 = arith.constant 0 : i32
    return %arg0, %arg1, %arg2 : i32, i32, i32
  }
  func.func @transform_1(%arg0: i32, %arg1: i32, %arg2: i32) -> (i32, i32) {
    %c0_i32 = arith.constant 0 : i32
    %c0_i32_0 = arith.constant 0 : i32
    return %arg2, %c0_i32 : i32, i32
  }
  func.func @transform_2(%arg0: i32, %arg1: i32, %arg2: i32) -> (i32, i32) {
    %c0_i32 = arith.constant 0 : i32
    %c0_i32_0 = arith.constant 0 : i32
    %c0_i32_1 = arith.constant 0 : i32
    return %c0_i32, %c0_i32_0 : i32, i32
  }
  func.func @transform_3(%arg0: i32, %arg1: i32, %arg2: i32) -> (i32, i32) {
    %c0_i32 = arith.constant 0 : i32
    %c0_i32_0 = arith.constant 0 : i32
    %c0_i32_1 = arith.constant 0 : i32
    return %c0_i32, %c0_i32_0 : i32, i32
  }
  func.func @transform_4(%arg0: i32, %arg1: i32, %arg2: i32) -> (i32, i32) {
    %c0_i32 = arith.constant 0 : i32
    %c0_i32_0 = arith.constant 0 : i32
    %c0_i32_1 = arith.constant 0 : i32
    return %c0_i32, %c0_i32_0 : i32, i32
  }
  func.func @transform_5(%arg0: i32, %arg1: i32, %arg2: i32) -> (i32, i32, i32, i32) {
    %c0_i32 = arith.constant 0 : i32
    %c0_i32_0 = arith.constant 0 : i32
    %c0_i32_1 = arith.constant 0 : i32
    return %arg0, %c0_i32, %arg1, %c0_i32_0 : i32, i32, i32, i32
  }
  func.func @transform_6(%arg0: i32, %arg1: i32, %arg2: i32) -> (i32, i32, i32, i32) {
    %c0_i32 = arith.constant 0 : i32
    %c0_i32_0 = arith.constant 0 : i32
    %c0_i32_1 = arith.constant 0 : i32
    return %arg0, %c0_i32, %arg1, %c0_i32_0 : i32, i32, i32, i32
  }
  func.func @transform_7(%arg0: i32, %arg1: i32, %arg2: i32) -> (i32, i32, i32, i32) {
    %c0_i32 = arith.constant 0 : i32
    %c0_i32_0 = arith.constant 0 : i32
    %c0_i32_1 = arith.constant 0 : i32
    return %arg0, %c0_i32, %arg1, %c0_i32_0 : i32, i32, i32, i32
  }
}

</mosaic_0001>

<bundles_post_ra>
// kernel: tpu_custom_call.1
= control target key start
LH: loop header
LB: loop body
LE: loop exit
PB: predicated region body
PF: predicated region fallthrough
CT: control target
= control target key end

     0   :  { %s1718_s0 = inlined_call_operand.hbm [shape: f32[2,8,32], index: 0, kind: input, shape index: {}]   ;;  %s1719_s1 = inlined_call_operand.hbm [shape: bf16[32,96], index: 1, kind: input, shape index: {}]   ;;  %s1720_s2 = inlined_call_operand.vmem [shape: f32[1,32], index: 2, kind: input, shape index: {}]   ;;  %s1721_s3 = inlined_call_operand.vmem [shape: f32[1,8], index: 3, kind: input, shape index: {}]   ;;  %s1722_s4 = inlined_call_operand.vmem [shape: f32[1,8], index: 4, kind: input, shape index: {}]   ;;  %s1723_s5 = inlined_call_operand.hbm [shape: f32[2,4,8,8], index: 5, kind: output, shape index: {0}]   ;;  %s1724_s6 = inlined_call_operand.hbm [shape: f32[2,4,8,8], index: 6, kind: output, shape index: {1}]   ;;  %s1725_s7 = inlined_call_operand.hbm [shape: f32[2,4,8,8], index: 7, kind: output, shape index: {2}]  }
   0x1   :  { %1732 = sst [smem:[#allocation17_spill]] %s1718_s0 }
   0x2   :  { %1733 = sst [smem:[#allocation18_spill]] %s1719_s1 }
   0x3   :  { %1734 = sst [smem:[#allocation19_spill]] %s1720_s2 }
   0x4   :  { %1735 = sst [smem:[#allocation20_spill]] %s1721_s3 }
   0x5   :  { %13 = vsyncpa [#allocation4], 0 }
   0x6   :  { %15 = vsyncpa [#allocation4 + $0x1], 0 }
   0x7   :  { %16 = vsyncpa [#allocation7], 0 }
   0x8   :  { %17 = vsyncpa [#allocation5], 0 }
   0x9   :  { %19 = vsyncpa [#allocation5 + $0x1], 0 }
   0xa   :  { %20 = vsyncpa [#allocation10], 0 }
   0xb   :  { %22 = vsyncpa [#allocation10 + $0x1], 0  ;;  %s1357_s24 = smov 0   ;;  %s1359_s25 = smov 0  }
   0xc   :  { %s1361_s26 = smov 0   ;;  %s1363_s27 = smov 0  }
   0xd   :  { %s1365_s28 = smov 0   ;;  %s1367_s29 = smov 0  }
   0xe LB: > { %s1388_s30 = sadd.s32 4294967295, %s1295_s29   ;;  %p921_p0 = scmp.ge.s32.totalorder %s1295_s29, 1  ;;  %s1295_s29 = sphi %s1367_s29, %s28_s29   ;;  %s1291_s28 = sphi %s1365_s28, %s1757_s28   ;;  %s1287_s27 = sphi %s1363_s27, %s1756_s27   ;;  %s1283_s26 = sphi %s1361_s26, %s1755_s26   ;;  %s1279_s25 = sphi %s1359_s25, %s1754_s25   ;;  %s1275_s24 = sphi %s1357_s24, %s1753_s24  }
   0xf   : > { %p72_p1 = scmp.eq.s32.totalorder %s1388_s30, 0  ;;  %p255_p2 = scmp.lt.s32.totalorder %s1295_s29, 3 }
  0x10   : > { %s1736_s1 = sld [smem:[#allocation18_spill]]  ;;  %s1297_s12 = smov [#allocation6]  }
  0x11   : > { %p1396_p3 = pnand %p921_p0, %p255_p2  ;;  %s271_s13 = sshll.u32 %s1297_s12, 4  ;;  %s272_s13 = int_to_ptr.vmem [resolvable:$true] %s271_s13 }
  0x12   : > { %p923_p6 = scmp.ge.s32.totalorder %s1295_s29, 2  ;;  %s1298_s14 = smov 64  }
  0x13   : > { %p978_p4 = pneg %p1396_p3  ;;  %s1299_s15 = smov 4  }
  0x14   : > { %s1726_s16 = sadd.s32 4294967294, %s1295_s29   ;;  %s47_s17 = sadd.s32 1, %s1291_s28 }
  0x15   : > { %p979_p5 = pnand %p978_p4, %p72_p1  ;;  %s58_s18 = sadd.s32 1, %s1283_s26 }
  0x16   : > { %s269_s10 = sshll.u32 %s1736_s1, 4  ;;  %p49_p7 = scmp.ge.s32.totalorder %s47_s17, 2  ;;  %s270_s10 = int_to_ptr.hbm [resolvable:$true] %s269_s10 }
  0x17   : > { %981 = dma.hbm_to_vmem [thread:$0]  (!%p979_p5), %s270_s10, 256, %s272_s13, [#allocation7], %s1298_s14, %s1298_s14, %s1299_s15  }
  0x18   : > { %p65_p8 = scmp.ne.s32.totalorder %s1283_s26, %s1279_s25  ;;  %p66_p9 = scmp.eq.s32.totalorder %s1295_s29, 0 }
  0x19   : > { %p71_p10 = scmp.ne.s32.totalorder %s1279_s25, %s1275_s24  ;;  %s1759_s17 = smov (%p49_p7, %s47_s17), 0 }
  0x1a   : > { %1738 = sst [smem:[#allocation16_spill]] %s1759_s17  ;;  %p1415_p11 = por %p66_p9, %p65_p8 }
  0x1b   : > { %p1421_p12 = por %p72_p1, %p71_p10  ;;  %s51_s21 = ssub.s32 %s1291_s28, %s1759_s17 }
  0x1c   : > { %p186_p13 = scmp.eq.s32.totalorder %s1388_s30, 1  ;;  %p56_p0 = scmp.eq.s32.totalorder %s51_s21, 0 }
  0x1d   : > { %p192_p2 = scmp.eq.s32.totalorder %s1726_s16, 1  ;;  %p997_p5 = scmp.lt.s32.totalorder %s1295_s29, 2 }
  0x1e   : > { %p1430_p4 = por %p186_p13, %p65_p8  ;;  %s294_s9 = sand.u32 1, %s1283_s26  }
  0x1f   : > { %s1436_s23 = scalar_select %p56_p0, %s1283_s26, %s58_s18  }
  0x20   : > { %p1438_p7 = por %p192_p2, %p71_p10  ;;  %s924_s10 = sshll.u32 %s294_s9, 3 }
  0x21   : > { %s925_s12 = sshll.u32 %s1291_s28, 3  ;;  %s1743_s0 = sld [smem:[#allocation17_spill]] }
  0x22   : > { %s298_s21 = scalar_lea.vmem [#allocation3], %s924_s10  ;;  %p983_p8 = pnand %p997_p5, %p1415_p11 }
  0x23   : > { %s308_s16 = sshll.u32 %s298_s21, 4  ;;  %s295_s18 = scalar_lea.sflag [#allocation4], %s294_s9  ;;  %s309_s16 = int_to_ptr.vmem [resolvable:$true] %s308_s16 }
  0x24   : > { %s1452_s17 = sand.u32 (!%p1396_p3), 1, %s1279_s25  }
  0x25   : > { %317 = sbr.rel (%p1396_p3) target bundleno = 604 (0x25c), region = 40  ;;  %s927_s13 = sshll.u32 (!%p1396_p3), %s1452_s17, 3 }
  0x26   : > { %s323_s10 = scalar_lea.vmem (!%p1396_p3), [#allocation3], %s927_s13 }
  0x27   : > { %s304_s15 = scalar_lea.hbm %s1743_s0, %s925_s12  ;;  %s320_s12 = scalar_lea.sflag (!%p1396_p3), [#allocation4], %s1452_s17 }
  0x28   : > { %s306_s1 = sshll.u32 %s304_s15, 4  ;;  %s307_s1 = int_to_ptr.hbm [resolvable:$true] %s306_s1 }
  0x29   : > { %985 = dma.hbm_to_vmem [thread:$0]  (!%p983_p8), %s307_s1, 128, %s309_s16, %s295_s18  }
  0x2a   : > { %1258 = dma.done.wait (%p1421_p12), %s320_s12, 128  }
  0x2b   : > { %1260 = vsyncadd (%p1421_p12), %s320_s12, 4294967168 }
  0x2c   : > { %1262 = dma.done.wait (%p72_p1), [#allocation7], 256  }
  0x2d   : > { %1264 = vsyncadd (%p72_p1), [#allocation7], 4294967040  ;;  %v962_v0 = vld [vmem:[#allocation6 + $0x8] sm:$0xff]  ;;  %s1744_s2 = sld [smem:[#allocation19_spill]]  ;;  %v961_v2 = vld [vmem:[#allocation6] sm:$0xff]  ;;  %s1300_s16 = smov 64  }
  0x2e   : > { %400 = vmatpush.bf16.msra.mxu0 %v962_v0  ;;  %v372_v3 = vld [vmem:[%s323_s10] sm:$0xff]  ;;  %vm390_vm0 = vcmask 261120   ;;  %v1069_v5 = vld [vmem:[%s1722_s4] ss:$0 sm:$0xff]  ;;  %s1301_s9 = smov 32   ;;  %vm407_vm1 = vcmask 785408  }
  0x2f   : > { %v373_v4 = vpack.c.bf16 %v372_v3, %v372_v3  ;;  %465 = vrot.lane.b32.xlu1 %v1069_v5, %s1301_s9  ;;  %s1302_s14 = smov 80   ;;  %s1303_s15 = smov 96   ;;  %vm419_vm2 = vcmask 64512   ;;  %v1314_v29 = vmov 8.0  }
  0x30   : > { %s1728_s21 = smov 112   ;;  %s1305_s18 = smov 120   ;;  %1071 = vrcp.f32 %v1314_v29 }
  0x31   : > { %s1306_s13 = smov 40   ;;  %s1307_s12 = smov 88  }
  0x32   : > { %401 = vmatpush.bf16.msra.mxu0 %v961_v2  ;;  %s1308_s10 = smov 48   ;;  %s1309_s1 = smov 72  }
  0x33   : > { %v1068_v1 = vld [vmem:[%s1744_s2] ss:$0 sm:$0xff]  ;;  %s1729_s11 = smov 104   ;;  %s1745_s3 = sld [smem:[#allocation20_spill]] }
  0x34   : > { %476 = vrot.lane.b32.xlu2 %v1068_v1, %s1300_s16  ;;  %s1730_s20 = smov 8   ;;  %s1312_s9 = smov 56  }
  0x35   : > { %940 = vmatmul.msk.bf16.vlgmr.msra.gmra.mxu0 %vm390_vm0, %v373_v4  ;;  %s1315_s19 = smov 24  }
  0x36   : > { %v1072_v31 = vpop.eup %1071 }
  0x37   : > { %v424_v32 = vmul.f32 8.0, %v1072_v31  ;;  %vm428_vm3 = vweird.f32 %v1072_v31 }
  0x39   : > { %v1490_v12 = vld [vmem:[%s1745_s3] ss:$0 sm:$0xff]  ;;  %v425_v33 = vsub.f32 1.0, %v424_v32  ;;  %s694_s3 = sand.u32 1, %s1388_s30  }
  0x3a   : > { %s1638_s0 = scalar_lea.sflag [#allocation10], %s694_s3 }
  0x3b   : > { %v426_v35 = vmul.f32 %v1072_v31, %v425_v33 }
  0x3d   : > { %v427_v36 = vadd.f32 %v1072_v31, %v426_v35 }
  0x3f   : > { %v1520_v37 = vsel %vm428_vm3, %v1072_v31, %v427_v36 }
  0x8e   : > { %v477_v7 = vpop.permute.xlu2 %476 }
  0xa1   : > { %v1505_v17 = vpop.permute.xlu1 %465 }
  0xb2   : > { %v403_v6 = vpop.f32.mrf.mxu0 }
  0xb3   : > { %408 = vst.msk [vmem:[#allocation2] sm:$0xff] %vm407_vm1, %v403_v6 }
  0xba   : > { %v405_v8 = vpop.f32.mrf.mxu0  ;;  %v1470_v9 = vld [vmem:[#allocation2] sm:$0xff] }
  0xbb   : > { %v554_v10 = vmul.f32 %v1470_v9, %v1470_v9  ;;  %v1475_v11 = vadd.f32 %v1470_v9, %v477_v7 }
  0xbd   : > { %563 = vrot.lane.b32.xlu1 %v554_v10, %s1302_s14  ;;  %481 = vrot.lane.b32.xlu2 %v1475_v11, %s1300_s16  ;;  %v420_v13 = vsel %vm419_vm2, %v554_v10, 0.0  ;;  %s1313_s16 = smov 16  }
  0xbe   : > { %432 = vrot.lane.b32.xlu0 %v554_v10, %s1303_s15 }
  0xc5   : > { %556 = vrot.lane.b32.xlu1 %v554_v10, %s1728_s21  ;;  %488 = vrot.lane.b32.xlu2 %v554_v10, %s1305_s18  ;;  %s1497_s21 = sshll.u32 %s1452_s17, 5 }
  0xc6   : > { %536 = vrot.lane.b32.xlu0 %v1069_v5, %s1306_s13 }
  0xcd   : > { %495 = vrot.lane.b32.xlu2 %v554_v10, %s1307_s12  ;;  %604 = vrot.lane.b32.xlu1 %v1069_v5, %s1308_s10 }
  0xd5   : > { %631 = vrot.lane.b32.xlu2 %v554_v10, %s1309_s1 }
  0xdd   : > { %624 = vrot.lane.b32.xlu2 %v554_v10, %s1729_s11  ;;  %s1500_s11 = scalar_lea.vmem [#allocation11], %s1497_s21 }
  0xe5   : > { %514 = vrot.lane.b32.xlu2 %v1490_v12, %s1730_s20 }
  0xed   : > { %672 = vrot.lane.b32.xlu2 %v1069_v5, %s1312_s9 }
  0xf0   : > { %421 = vadd.xlane.f32.xlu0 %v420_v13 }
 0x117   : > { %v482_v14 = vpop.permute.xlu2 %481 }
 0x118   : > { %484 = vst.msk [vmem:[%s1500_s11] sm:$0xff] %vm419_vm2, %v482_v14 }
 0x11f   : > { %v489_v15 = vpop.permute.xlu2 %488 }
 0x120   : > { %v491_v16 = vsel %vm419_vm2, %v489_v15, 0.0 }
 0x121   : > { %492 = vadd.xlane.f32.xlu0 %v491_v16 }
 0x127   : > { %v496_v18 = vpop.permute.xlu2 %495 }
 0x128   : > { %v498_v25 = vsel %vm419_vm2, %v496_v18, 0.0 }
 0x12f   : > { %v564_v19 = vpop.permute.xlu1 %563  ;;  %v632_v20 = vpop.permute.xlu2 %631 }
 0x130   : > { %v433_v21 = vpop.permute.xlu0 %432  ;;  %v566_v22 = vsel %vm419_vm2, %v564_v19, 0.0  ;;  %v634_v23 = vsel %vm419_vm2, %v632_v20, 0.0 }
 0x131   : > { %567 = vadd.xlane.f32.xlu2 %v566_v22  ;;  %v435_v24 = vsel %vm419_vm2, %v433_v21, 0.0  ;;  %635 = vadd.xlane.f32.xlu0 %v634_v23 }
 0x132   : > { %436 = vadd.xlane.f32.xlu1 %v435_v24 }
 0x137   : > { %v557_v26 = vpop.permute.xlu1 %556  ;;  %v625_v28 = vpop.permute.xlu2 %624 }
 0x138   : > { %v559_v27 = vsel %vm419_vm2, %v557_v26, 0.0  ;;  %v627_v30 = vsel %vm419_vm2, %v625_v28, 0.0  ;;  %v1518_v34 = vpop.permute.xlu0 %536 }
 0x13a   : > { %499 = vadd.xlane.f32.xlu1 %v498_v25 }
 0x13f   : > { %v1533_v50 = vpop.permute.xlu2 %514  ;;  %v1538_v54 = vpop.permute.xlu1 %604 }
 0x142   : > { %560 = vadd.xlane.f32.xlu1 %v559_v27 }
 0x145   : > { %582 = vrot.lane.b32.xlu0 %v1490_v12, %s1313_s16 }
 0x147   : > { %v1536_v53 = vpop.permute.xlu2 %672 }
 0x14a   : > { %628 = vadd.xlane.f32.xlu1 %v627_v30 }
 0x14d   : > { %616 = vrot.lane.b32.xlu0 %v1475_v11, %s1308_s10 }
 0x155   : > { %684 = vrot.lane.b32.xlu0 %v1475_v11, %s1306_s13  ;;  %s1529_s13 = scalar_lea.vmem [#allocation8], %s1497_s21 }
 0x163   : > { %650 = vrot.lane.b32.xlu1 %v1490_v12, %s1315_s19  ;;  %v422_v38 = vpop.xlane.xlu0 %421  ;;  %s713_s19 = sshll.u32 %s1529_s13, 4  ;;  %s1624_s19 = int_to_ptr.vmem [resolvable:$true] %s713_s19 }
 0x164   : > { %v430_v39 = vmul.f32 %v1520_v37, %v422_v38 }
 0x166   : > { %v439_v40 = vadd.f32 1e-06, %v430_v39 }
 0x168   : > { %1073 = vrsqrt.f32 %v439_v40  ;;  %vm446_vm5 = vweird.f32 %v439_v40 }
 0x16b   : > { %548 = vrot.lane.b32.xlu1 %v1475_v11, %s1312_s9 }
 0x16e   : > { %v1074_v41 = vpop.eup %1073 }
 0x16f   : > { %v441_v42 = vmul.f32 %v1074_v41, %v439_v40  ;;  %vm447_vm4 = vweird.f32 %v1074_v41 }
 0x170   : > { %vm448_vm6 = vmor %vm446_vm5, %vm447_vm4 }
 0x171   : > { %v442_v43 = vmul.f32 %v1074_v41, %v441_v42 }
 0x173   : > { %v443_v44 = vmul.f32 0.5, %v442_v43 }
 0x175   : > { %v444_v45 = vsub.f32 1.5, %v443_v44 }
 0x177   : > { %v445_v46 = vmul.f32 %v1074_v41, %v444_v45 }
 0x179   : > { %v449_v47 = vsel %vm448_vm6, %v1074_v41, %v445_v46 }
 0x17a   : > { %v450_v48 = vmul.f32 %v1470_v9, %v449_v47 }
 0x17c   : > { %v451_v49 = vmul.f32 %v1490_v12, %v450_v48 }
 0x17e   : > { %452 = vst.msk [vmem:[%s1529_s13] sm:$0xff] %vm419_vm2, %v451_v49 }
 0x194   : > { %v493_v51 = vpop.xlane.xlu0 %492 }
 0x195   : > { %v494_v52 = vmul.f32 %v493_v51, %v1520_v37 }
 0x197   : > { %v1540_v55 = vadd.f32 1e-06, %v494_v52 }
 0x199   : > { %1075 = vrsqrt.f32 %v1540_v55  ;;  %vm509_vm0 = vweird.f32 %v1540_v55 }
 0x19f   : > { %v1546_v0 = vpop.eup %1075 }
 0x1a0   : > { %v504_v2 = vmul.f32 %v1546_v0, %v1540_v55  ;;  %vm510_vm10 = vweird.f32 %v1546_v0 }
 0x1a1   : > { %vm511_vm3 = vmor %vm509_vm0, %vm510_vm10 }
 0x1a2   : > { %v505_v6 = vmul.f32 %v1546_v0, %v504_v2 }
 0x1a4   : > { %v568_v56 = vpop.xlane.xlu2 %567  ;;  %v636_v57 = vpop.xlane.xlu0 %635  ;;  %v506_v15 = vmul.f32 0.5, %v505_v6 }
 0x1a5   : > { %v569_v58 = vmul.f32 %v568_v56, %v1520_v37  ;;  %v437_v59 = vpop.xlane.xlu1 %436  ;;  %v637_v60 = vmul.f32 %v636_v57, %v1520_v37 }
 0x1a6   : > { %v438_v61 = vmul.f32 %v437_v59, %v1520_v37  ;;  %v507_v25 = vsub.f32 1.5, %v506_v15 }
 0x1a7   : > { %v592_v62 = vadd.f32 1e-06, %v569_v58  ;;  %v660_v63 = vadd.f32 1e-06, %v637_v60 }
 0x1a8   : > { %v453_v1 = vadd.f32 1e-06, %v438_v61  ;;  %v508_v38 = vmul.f32 %v1546_v0, %v507_v25 }
 0x1a9   : > { %1077 = vrsqrt.f32 %v592_v62  ;;  %vm599_vm9 = vweird.f32 %v592_v62  ;;  %vm667_vm15 = vweird.f32 %v660_v63 }
 0x1aa   : > { %1079 = vrsqrt.f32 %v453_v1  ;;  %vm460_vm12 = vweird.f32 %v453_v1  ;;  %v512_v55 = vsel %vm511_vm3, %v1546_v0, %v508_v38 }
 0x1ab   : > { %1081 = vrsqrt.f32 %v660_v63 }
 0x1ad   : > { %v500_v3 = vpop.xlane.xlu1 %499 }
 0x1ae   : > { %v501_v4 = vmul.f32 %v500_v3, %v1520_v37 }
 0x1af   : > { %v1078_v5 = vpop.eup %1077 }
 0x1b0   : > { %v1080_v7 = vpop.eup %1079  ;;  %v594_v8 = vmul.f32 %v1078_v5, %v592_v62  ;;  %v1552_v10 = vadd.f32 1e-06, %v501_v4  ;;  %vm600_vm7 = vweird.f32 %v1078_v5 }
 0x1b1   : > { %v1082_v11 = vpop.eup %1081  ;;  %v455_v12 = vmul.f32 %v1080_v7, %v453_v1  ;;  %vm461_vm8 = vweird.f32 %v1080_v7  ;;  %vm601_vm11 = vmor %vm599_vm9, %vm600_vm7 }
 0x1b2   : > { %v595_v13 = vmul.f32 %v1078_v5, %v594_v8  ;;  %v662_v14 = vmul.f32 %v1082_v11, %v660_v63  ;;  %1083 = vrsqrt.f32 %v1552_v10  ;;  %vm462_vm13 = vmor %vm460_vm12, %vm461_vm8  ;;  %vm668_vm14 = vweird.f32 %v1082_v11 }
 0x1b3   : > { %v456_v16 = vmul.f32 %v1080_v7, %v455_v12  ;;  %vm1564_vm1 = vmor %vm667_vm15, %vm668_vm14  ;;  %vm531_vm5 = vweird.f32 %v1552_v10 }
 0x1b4   : > { %v596_v18 = vmul.f32 0.5, %v595_v13  ;;  %v663_v19 = vmul.f32 %v1082_v11, %v662_v14 }
 0x1b5   : > { %v457_v20 = vmul.f32 0.5, %v456_v16  ;;  %v561_v21 = vpop.xlane.xlu1 %560 }
 0x1b6   : > { %v597_v22 = vsub.f32 1.5, %v596_v18  ;;  %v664_v23 = vmul.f32 0.5, %v663_v19  ;;  %v562_v24 = vmul.f32 %v561_v21, %v1520_v37 }
 0x1b7   : > { %v458_v26 = vsub.f32 1.5, %v457_v20  ;;  %v1556_v27 = vpop.permute.xlu0 %582 }
 0x1b8   : > { %v1084_v28 = vpop.eup %1083  ;;  %v598_v29 = vmul.f32 %v1078_v5, %v597_v22  ;;  %v665_v30 = vsub.f32 1.5, %v664_v23  ;;  %v570_v31 = vadd.f32 1e-06, %v562_v24 }
 0x1b9   : > { %v459_v32 = vmul.f32 %v1080_v7, %v458_v26  ;;  %v526_v33 = vmul.f32 %v1084_v28, %v1552_v10  ;;  %vm532_vm4 = vweird.f32 %v1084_v28 }
 0x1ba   : > { %v666_v35 = vmul.f32 %v1082_v11, %v665_v30  ;;  %1085 = vrsqrt.f32 %v570_v31  ;;  %v602_v36 = vsel %vm601_vm11, %v1078_v5, %v598_v29  ;;  %vm533_vm6 = vmor %vm531_vm5, %vm532_vm4  ;;  %vm577_vm8 = vweird.f32 %v570_v31 }
 0x1bb   : > { %v527_v39 = vmul.f32 %v1084_v28, %v526_v33  ;;  %v603_v40 = vmul.f32 %v602_v36, %v1470_v9  ;;  %v463_v41 = vsel %vm462_vm13, %v1080_v7, %v459_v32 }
 0x1bc   : > { %v464_v42 = vmul.f32 %v1470_v9, %v463_v41  ;;  %v670_v49 = vsel %vm1564_vm1, %v1082_v11, %v666_v35 }
 0x1bd   : > { %v528_v44 = vmul.f32 0.5, %v527_v39  ;;  %v629_v45 = vpop.xlane.xlu1 %628  ;;  %v607_v46 = vmul.f32 %v1538_v54, %v603_v40 }
 0x1be   : > { %v630_v47 = vmul.f32 %v629_v45, %v1520_v37  ;;  %v468_v48 = vmul.f32 %v1505_v17, %v464_v42  ;;  %v671_v37 = vmul.f32 %v670_v49, %v1470_v9  ;;  %v513_v17 = vmul.f32 %v1470_v9, %v512_v55 }
 0x1bf   : > { %v529_v51 = vsub.f32 1.5, %v528_v44  ;;  %609 = vrot.lane.b32.xlu1 %v607_v46, %s1302_s14  ;;  %v617_v52 = vpop.permute.xlu0 %616  ;;  %s1748_s14 = smov 112  }
 0x1c0   : > { %v1086_v56 = vpop.eup %1085  ;;  %v638_v57 = vadd.f32 1e-06, %v630_v47  ;;  %470 = vrot.lane.b32.xlu2 %v468_v48, %s1303_s15  ;;  %946 = vst.msk [vmem:[%s1500_s11 + $0x10] sm:$0xff] %vm419_vm2, %v617_v52  ;;  %v675_v61 = vmul.f32 %v1536_v53, %v671_v37  ;;  %v517_v62 = vmul.f32 %v1533_v50, %v513_v17  ;;  %s1749_s15 = smov 104  }
 0x1c1   : > { %v572_v54 = vmul.f32 %v1086_v56, %v570_v31  ;;  %v530_v58 = vmul.f32 %v1084_v28, %v529_v51  ;;  %vm578_vm7 = vweird.f32 %v1086_v56 }
 0x1c2   : > { %1087 = vrsqrt.f32 %v638_v57  ;;  %vm579_vm9 = vmor %vm577_vm8, %vm578_vm7  ;;  %vm645_vm11 = vweird.f32 %v638_v57 }
 0x1c3   : > { %v573_v59 = vmul.f32 %v1086_v56, %v572_v54  ;;  %v534_v1 = vsel %vm533_vm6, %v1084_v28, %v530_v58 }
 0x1c4   : > { %v535_v4 = vmul.f32 %v1470_v9, %v534_v1 }
 0x1c5   : > { %v574_v60 = vmul.f32 0.5, %v573_v59 }
 0x1c6   : > { %v539_v50 = vmul.f32 %v1518_v34, %v535_v4 }
 0x1c7   : > { %v575_v63 = vsub.f32 1.5, %v574_v60  ;;  %677 = vrot.lane.b32.xlu1 %v675_v61, %s1309_s1  ;;  %v685_v0 = vpop.permute.xlu0 %684  ;;  %s749_s1 = sshll.u32 %s1500_s11, 4  ;;  %s1633_s1 = int_to_ptr.vmem [resolvable:$true] %s749_s1 }
 0x1c8   : > { %v1088_v2 = vpop.eup %1087  ;;  %519 = vrot.lane.b32.xlu2 %v517_v62, %s1305_s18  ;;  %949 = vst.msk [vmem:[%s1500_s11 + $0x18] sm:$0xff] %vm419_vm2, %v685_v0  ;;  %s362_s18 = scalar_lea.vmem [#allocation9], %s1497_s21 }
 0x1c9   : > { %v640_v3 = vmul.f32 %v1088_v2, %v638_v57  ;;  %v576_v5 = vmul.f32 %v1086_v56, %v575_v63  ;;  %vm646_vm10 = vweird.f32 %v1088_v2  ;;  %s731_s10 = sshll.u32 %s362_s18, 4  ;;  %s1616_s10 = int_to_ptr.vmem [resolvable:$true] %s731_s10 }
 0x1ca   : > { %vm647_vm12 = vmor %vm645_vm11, %vm646_vm10 }
 0x1cb   : > { %v641_v6 = vmul.f32 %v1088_v2, %v640_v3  ;;  %v580_v7 = vsel %vm579_vm9, %v1086_v56, %v576_v5 }
 0x1cc   : > { %v581_v10 = vmul.f32 %v580_v7, %v1470_v9 }
 0x1cd   : > { %v642_v53 = vmul.f32 0.5, %v641_v6 }
 0x1ce   : > { %v585_v13 = vmul.f32 %v1556_v27, %v581_v10 }
 0x1cf   : > { %v643_v8 = vsub.f32 1.5, %v642_v53 }
 0x1d0   : > { %541 = vrot.lane.b32.xlu2 %v539_v50, %s1307_s12  ;;  %s963_s12 = sshll.u32 %s1287_s27, 5 }
 0x1d1   : > { %v644_v11 = vmul.f32 %v1088_v2, %v643_v8  ;;  %s730_s16 = scalar_lea.hbm %s1724_s6, %s963_s12  ;;  %s712_s20 = scalar_lea.hbm %s1723_s5, %s963_s12 }
 0x1d2   : > { %s748_s2 = scalar_lea.hbm %s1725_s7, %s963_s12  ;;  %s1626_s9 = sshll.u32 %s712_s20, 4  ;;  %s716_s9 = int_to_ptr.hbm [resolvable:$true] %s1626_s9 }
 0x1d3   : > { %v648_v14 = vsel %vm647_vm12, %v1088_v2, %v644_v11  ;;  %s1628_s21 = sshll.u32 %s748_s2, 4  ;;  %s752_s21 = int_to_ptr.hbm [resolvable:$true] %s1628_s21 }
 0x1d4   : > { %v649_v34 = vmul.f32 %v648_v14, %v1470_v9 }
 0x1d5   : > { %v651_v12 = vpop.permute.xlu1 %650 }
 0x1d6   : > { %v653_v16 = vmul.f32 %v651_v12, %v649_v34 }
 0x1d8   : > { %587 = vrot.lane.b32.xlu2 %v585_v13, %s1748_s14 }
 0x1dd   : > { %v549_v15 = vpop.permute.xlu1 %548 }
 0x1de   : > { %943 = vst.msk [vmem:[%s1500_s11 + $0x8] sm:$0xff] %vm419_vm2, %v549_v15  ;;  %s1622_s11 = sshll.u32 %s730_s16, 4  ;;  %s734_s11 = int_to_ptr.hbm [resolvable:$true] %s1622_s11 }
 0x1df   : > { %s1163_s30 = sshra.s32 %s734_s11, 4  ;;  %s1164_s30 = int_to_ptr.hbm [resolvable:$true] %s1163_s30 }
 0x1e0   : > { %655 = vrot.lane.b32.xlu2 %v653_v16, %s1749_s15  ;;  %s1165_s20 = scalar_lea.hbm %s1164_s30, 32  ;;  %p1170_p10 = scmp.lt.s32.totalorder %s1164_s30, %s1724_s6 }
 0x1e1   : > { %p1166_p1 = scmp.ne.s32.totalorder %s1164_s30, %s1165_s20 }
 0x1e3   : > { %p1167_p3 = pnand %p1166_p1, %p1430_p4 }
 0x1e5   : > { %p1168_p9 = pneg %p1167_p3 }
 0x21a   : > { %v471_v18 = vpop.permute.xlu2 %470 }
 0x21b   : > { %473 = vst.msk [vmem:[%s362_s18] sm:$0xff] %vm419_vm2, %v471_v18 }
 0x222   : > { %v520_v19 = vpop.permute.xlu2 %519 }
 0x223   : > { %941 = vst.msk [vmem:[%s1529_s13 + $0x8] sm:$0xff] %vm419_vm2, %v520_v19 }
 0x22a   : > { %v542_v20 = vpop.permute.xlu2 %541 }
 0x22b   : > { %942 = vst.msk [vmem:[%s362_s18 + $0x8] sm:$0xff] %vm419_vm2, %v542_v20 }
 0x231   : > { %v610_v9 = vpop.permute.xlu1 %609 }
 0x232   : > { %945 = vst.msk [vmem:[%s362_s18 + $0x10] sm:$0xff] %vm419_vm2, %v610_v9  ;;  %v588_v21 = vpop.permute.xlu2 %587 }
 0x233   : > { %944 = vst.msk [vmem:[%s1529_s13 + $0x10] sm:$0xff] %vm419_vm2, %v588_v21 }
 0x239   : > { %v678_v22 = vpop.permute.xlu1 %677 }
 0x23a   : > { %948 = vst.msk [vmem:[%s362_s18 + $0x18] sm:$0xff] %vm419_vm2, %v678_v22  ;;  %v656_v23 = vpop.permute.xlu2 %655  ;;  %s1169_s18 = scalar_lea.hbm %s1724_s6, 64 }
 0x23b   : > { %947 = vst.msk [vmem:[%s1529_s13 + $0x18] sm:$0xff] %vm419_vm2, %v656_v23  ;;  %p1171_p11 = scmp.lt.s32.totalorder %s1169_s18, %s1165_s20 }
 0x23d   : > { %p1172_p12 = por %p1171_p11, %p1170_p10 }
 0x23f   : > { %p1173_p13 = pnand %p1172_p12, %p1168_p9 }
 0x241   : > { %1176 = shalt.err (!%p1173_p13)
}
 0x242   : > { %s1316_s3 = smov 128   ;;  %s1750_s13 = smov 8  }
 0x243   : > { %973 = dma.vmem_to_hbm [thread:$0]  (%p1430_p4), %s1616_s10, 512, %s734_s11, %s1638_s0, %s1316_s3, %s1316_s3, %s1750_s13  }
 0x244   : > { %s690_s15 = scalar_lea.sflag [#allocation5], %s1452_s17  ;;  %s1191_s27 = sshra.s32 %s716_s9, 4  ;;  %s1192_s27 = int_to_ptr.hbm [resolvable:$true] %s1191_s27 }
 0x245   : > { %s1193_s30 = scalar_lea.hbm %s1192_s27, 32  ;;  %s1197_s12 = scalar_lea.hbm %s1723_s5, 64 }
 0x246   : > { %p1194_p0 = scmp.ne.s32.totalorder %s1192_s27, %s1193_s30  ;;  %p1198_p8 = scmp.lt.s32.totalorder %s1192_s27, %s1723_s5 }
 0x247   : > { %p1199_p1 = scmp.lt.s32.totalorder %s1197_s12, %s1193_s30 }
 0x248   : > { %p1195_p2 = pnand %p1194_p0, %p1430_p4 }
 0x249   : > { %p1200_p3 = por %p1199_p1, %p1198_p8 }
 0x24a   : > { %p1196_p5 = pneg %p1195_p2 }
 0x24c   : > { %p1201_p9 = pnand %p1200_p3, %p1196_p5 }
 0x24e   : > { %1204 = shalt.err (!%p1201_p9)
}
 0x24f   : > { %972 = dma.vmem_to_hbm [thread:$0]  (%p1430_p4), %s1624_s19, 512, %s716_s9, %s690_s15, %s1316_s3, %s1316_s3, %s1750_s13  }
 0x250   : > { %s1219_s17 = sshra.s32 %s752_s21, 4  ;;  %s1225_s27 = scalar_lea.hbm %s1725_s7, 64  ;;  %s1220_s17 = int_to_ptr.hbm [resolvable:$true] %s1219_s17 }
 0x251   : > { %s1221_s10 = scalar_lea.hbm %s1220_s17, 32  ;;  %p1226_p13 = scmp.lt.s32.totalorder %s1220_s17, %s1725_s7 }
 0x252   : > { %p1222_p10 = scmp.ne.s32.totalorder %s1220_s17, %s1221_s10  ;;  %p1227_p0 = scmp.lt.s32.totalorder %s1225_s27, %s1221_s10 }
 0x254   : > { %p1223_p11 = pnand %p1222_p10, %p1430_p4  ;;  %p1228_p2 = por %p1227_p0, %p1226_p13 }
 0x256   : > { %p1224_p12 = pneg %p1223_p11 }
 0x258   : > { %p1229_p5 = pnand %p1228_p2, %p1224_p12 }
 0x25a   : > { %1232 = shalt.err (!%p1229_p5)
}
 0x25b   : > { %974 = dma.vmem_to_hbm [thread:$0]  (%p1430_p4), %s1633_s1, 512, %s752_s21, %s1638_s0, %s1316_s3, %s1316_s3, %s1750_s13  }
 0x25c PF: > { %s766_s19 = sand.u32 1, %s1275_s24   ;;  %p987_p8 = pnand %p923_p6, %p1438_p7 }
 0x25d   : > { %s767_s9 = scalar_lea.sflag [#allocation5], %s766_s19 }
 0x25e   : > { %p988_p1 = pneg %p987_p8 }
 0x260   : > { %1266 = dma.done.wait (%p988_p1), %s767_s9, 512  }
 0x261   : > { %1268 = vsyncadd (%p988_p1), %s767_s9, 4294966784  ;;  %s1751_s22 = sadd.s32 4294967294, %s1295_s29  }
 0x262   : > { %s776_s15 = sand.u32 1, %s1751_s22  }
 0x263   : > { %s777_s2 = scalar_lea.sflag [#allocation10], %s776_s15 }
 0x264   : > { %1270 = dma.done.wait (%p988_p1), %s777_s2, 1024  }
 0x265   : > { %1272 = vsyncadd (%p988_p1), %s777_s2, 4294966272  ;;  %s28_s29 = sadd.s32 1, %s1295_s29   ;;  %s1752_s8 = sld [smem:[#allocation16_spill]] }
 0x266   : > { %p25_p4 = scmp.ge.s32.totalorder %s28_s29, 4   ;;  %s1753_s24 = smov %s1279_s25 }
 0x267   : > { %s1754_s25 = smov %s1283_s26  ;;  %s1755_s26 = smov %s1436_s23 }
 0x268   : > { %s1756_s27 = smov %s1291_s28  ;;  %27 = sbr.rel (!%p25_p4) target bundleno = 14 (0xe), region = 131 }
 0x26b   : > { %s1757_s28 = smov %s1752_s8 }
 0x26d   :  { %793 = vsyncpa [#allocation4], 1 }
 0x26e   :  { %795 = vsyncpa [#allocation4 + $0x1], 1 }
 0x26f   :  { %796 = vsyncpa [#allocation7], 1 }
 0x270   :  { %797 = vsyncpa [#allocation5], 1 }
 0x271   :  { %799 = vsyncpa [#allocation5 + $0x1], 1 }
 0x272   :  { %800 = vsyncpa [#allocation10], 1 }
 0x273   :  { %802 = vsyncpa [#allocation10 + $0x1], 1 }

</bundles_post_ra>
